<compile_context>
chip_gen: v5e
topology: v5e:2x2
jax: 0.10.0
libtpu: 0.0.40
codegen_flags: <defaults>
</compile_context>

<pallas_src>
import math

import jax
import jax.numpy as jnp
from jax import lax
from jax.experimental import pallas as pl
from jax.experimental.pallas import tpu as pltpu


def _pick_heads_per_group(num_heads, head_dim):
    """Smallest divisor G of num_heads with G*dh >= 256 and lane-aligned;
    otherwise process all heads in one group."""
    for g in range(1, num_heads + 1):
        if num_heads % g == 0 and g * head_dim >= 256 and (g * head_dim) % 128 == 0:
            return g
    return num_heads


def prun_vit_self_attention(hidden_states, wq, wk, wv, bq, bk, bv,
                            attention_mask, num_heads):
    """hidden_states: (B, S, D); w*: (D, D) laid out [in, out]; b*: (D,);
    attention_mask: (B, 1, 1, S) additive.  Returns context_layer (B, S, D).

    Note: bk is accepted for API parity but intentionally not applied -- it
    cancels exactly in the row softmax (shift invariance)."""
    orig_dtype = hidden_states.dtype
    B, S, D = hidden_states.shape
    dh = D // num_heads
    G = _pick_heads_per_group(num_heads, dh)     # heads per grid block
    num_groups = num_heads // G
    gdh = G * dh

    # --- pad S up to a sublane multiple; mask padded keys additively ---------
    S_pad = ((S + 7) // 8) * 8
    mask_f32 = attention_mask.astype(jnp.float32)
    if S_pad != S:
        hidden_states = jnp.pad(hidden_states, ((0, 0), (0, S_pad - S), (0, 0)))
        mask_f32 = jnp.pad(mask_f32, ((0, 0), (0, 0), (0, 0), (0, S_pad - S)),
                           constant_values=-1e9)

    # --- fuse Wq|Wk|Wv per head-group: (num_groups, D, 3*G*dh), bf16 ---------
    def group_w(w):
        return jnp.transpose(w.reshape(D, num_groups, gdh), (1, 0, 2))

    w_fused = jnp.concatenate([group_w(wq), group_w(wk), group_w(wv)],
                              axis=-1).astype(jnp.bfloat16)
    bq_g = bq.reshape(num_groups, 1, gdh).astype(jnp.float32)
    bv_g = bv.reshape(num_groups, 1, gdh).astype(jnp.float32)

    x_bf16 = hidden_states.astype(jnp.bfloat16)
    inv_sqrt_dh = 1.0 / math.sqrt(dh)

    def kernel(x_ref, w_ref, bq_ref, bv_ref, mask_ref, out_ref):
        x = x_ref[0]                                   # (S_pad, D) bf16
        w = w_ref[0]                                   # (D, 3*gdh) bf16
        # Fused QKV projection on the MXU with f32 accumulation.
        qkv = jnp.dot(x, w, preferred_element_type=jnp.float32)   # (S_pad, 3*gdh)
        q = qkv[:, :gdh] + bq_ref[0]
        k = qkv[:, gdh:2 * gdh]                        # key bias dropped
        v = qkv[:, 2 * gdh:] + bv_ref[0]
        mask = mask_ref[0, 0]                          # (1, S_pad) additive mask

        for h in range(G):                             # unrolled per-head attention
            lo, hi = h * dh, (h + 1) * dh
            qh = q[:, lo:hi].astype(jnp.bfloat16)
            kh = k[:, lo:hi].astype(jnp.bfloat16)
            vh = v[:, lo:hi].astype(jnp.bfloat16)
            # Contract head_dim axes directly (no explicit k.T materialization).
            s = lax.dot_general(qh, kh, (((1,), (1,)), ((), ())),
                                preferred_element_type=jnp.float32)  # (S_pad, S_pad)
            s = s * inv_sqrt_dh + mask
            m = jnp.max(s, axis=-1, keepdims=True)
            e = jnp.exp(s - m)
            p = e * pl.reciprocal(jnp.sum(e, axis=-1, keepdims=True), approx=True)
            # TODO(synk): training-mode attention-prob dropout not wired in.
            ctx = jnp.dot(p.astype(jnp.bfloat16), vh,
                          preferred_element_type=jnp.float32)        # (S_pad, dh)
            # Write directly into the (B, S, D)-layout output block.
            out_ref[0, :, lo:hi] = ctx.astype(out_ref.dtype)

    # groups outer, batch inner -> fused weights stay VMEM-resident over B.
    grid = (num_groups, B)

    x_spec = pl.BlockSpec((1, S_pad, D), lambda g, b: (b, 0, 0))
    w_spec = pl.BlockSpec((1, D, 3 * gdh), lambda g, b: (g, 0, 0))
    b_spec = pl.BlockSpec((1, 1, gdh), lambda g, b: (g, 0, 0))
    mask_spec = pl.BlockSpec((1, 1, 1, S_pad), lambda g, b: (b, 0, 0, 0))
    out_spec = pl.BlockSpec((1, S_pad, gdh), lambda g, b: (b, 0, g))

    cost = pl.CostEstimate(
        flops=2 * B * S_pad * D * 3 * D + 4 * B * num_heads * S_pad * S_pad * dh,
        transcendentals=B * num_heads * S_pad * S_pad,
        bytes_accessed=(x_bf16.size * 2 + w_fused.size * 2
                        + (bq_g.size + bv_g.size + mask_f32.size) * 4
                        + B * S_pad * D * 4),
    )

    ctx_out = pl.pallas_call(
        kernel,
        out_shape=jax.ShapeDtypeStruct((B, S_pad, D), orig_dtype),
        grid=grid,
        in_specs=[x_spec, w_spec, b_spec, b_spec, mask_spec],
        out_specs=out_spec,
        compiler_params=pltpu.CompilerParams(
            dimension_semantics=("parallel", "parallel"),
            vmem_limit_bytes=64 * 1024 * 1024),
        cost_estimate=cost,
    )(x_bf16, w_fused, bq_g, bv_g, mask_f32)

    return ctx_out[:, :S, :]


def _reference(hidden_states, wq, wk, wv, bq, bk, bv, attention_mask,
               num_heads):
    B, S, D = hidden_states.shape
    dh = D // num_heads

    def proj(w, b):
        y = hidden_states @ w + b                     # (B, S, D)
        return jnp.transpose(y.reshape(B, S, num_heads, dh), (0, 2, 1, 3))

    q = proj(wq, bq)
    k = proj(wk, bk)
    v = proj(wv, bv)
    scores = jnp.einsum("bhqd,bhkd->bhqk", q, k) / math.sqrt(dh)
    scores = scores + attention_mask.astype(jnp.float32)
    probs = jax.nn.softmax(scores, axis=-1)
    ctx = jnp.einsum("bhqk,bhkd->bhqd", probs, v)
    return jnp.transpose(ctx, (0, 2, 1, 3)).reshape(B, S, D)


if __name__ == "__main__":
    # Small config: batch=2, seq=8, hidden=32, heads=4 -> head_dim=8
    B, S, D, NH = 2, 8, 32, 4

    key = jax.random.PRNGKey(0)
    ks = jax.random.split(key, 8)
    hidden_states = jax.random.normal(ks[0], (B, S, D), dtype=jnp.float32)
    wq = jax.random.normal(ks[1], (D, D), dtype=jnp.float32) * 0.05
    wk = jax.random.normal(ks[2], (D, D), dtype=jnp.float32) * 0.05
    wv = jax.random.normal(ks[3], (D, D), dtype=jnp.float32) * 0.05
    bq = jax.random.normal(ks[4], (D,), dtype=jnp.float32) * 0.01
    bk = jax.random.normal(ks[5], (D,), dtype=jnp.float32) * 0.01
    bv = jax.random.normal(ks[6], (D,), dtype=jnp.float32) * 0.01
    # additive attention mask (e.g. padding mask), broadcast over heads/queries
    attention_mask = jnp.where(
        jax.random.uniform(ks[7], (B, 1, 1, S)) > 0.8, -1e4, 0.0
    ).astype(jnp.float32)

    out = prun_vit_self_attention(hidden_states, wq, wk, wv, bq, bk, bv,
                                  attention_mask, NH)
    out = jax.block_until_ready(out)

    ref = _reference(hidden_states, wq, wk, wv, bq, bk, bv, attention_mask, NH)
    assert out.shape == (B, S, D)
    max_err = jnp.max(jnp.abs(out - ref))
    # bf16 matmul operands + approx reciprocal => relaxed tolerance vs f32 ref
    assert jnp.allclose(out, ref, atol=2e-2, rtol=2e-2), f"max err {max_err}"

    print("KERNEL_OK")
</pallas_src>

<mosaic_0001>
module attributes {stable_mosaic.version = 11 : i64} {
  func.func @kernel(%arg0: i32, %arg1: i32, %arg2: memref<1x8x32xbf16, #tpu.memory_space<vmem>>, %arg3: memref<1x32x96xbf16, #tpu.memory_space<vmem>>, %arg4: memref<1x1x32xf32, #tpu.memory_space<vmem>>, %arg5: memref<1x1x32xf32, #tpu.memory_space<vmem>>, %arg6: memref<1x1x1x8xf32, #tpu.memory_space<vmem>>, %arg7: memref<1x8x32xf32, #tpu.memory_space<vmem>>) attributes {dimension_semantics = [#tpu.dimension_semantics<parallel>, #tpu.dimension_semantics<parallel>], iteration_bounds = array<i64: 1, 2>, scalar_prefetch = 0 : i64, scratch_operands = 0 : i64, tpu.core_type = #tpu.core_type<tc>, window_params = [{transform_indices = @transform_0, window_bounds = array<i64: 1, 8, 32>}, {transform_indices = @transform_1, window_bounds = array<i64: 1, 32, 96>}, {transform_indices = @transform_2, window_bounds = array<i64: 1, 1, 32>}, {transform_indices = @transform_3, window_bounds = array<i64: 1, 1, 32>}, {transform_indices = @transform_4, window_bounds = array<i64: 1, 1, 1, 8>}, {transform_indices = @transform_5, window_bounds = array<i64: 1, 8, 32>}]} {
    %c0 = arith.constant 0 : index
    %c0_0 = arith.constant 0 : index
    %c0_1 = arith.constant 0 : index
    %0 = vector.load %arg2[%c0, %c0_0, %c0_1] : memref<1x8x32xbf16, #tpu.memory_space<vmem>>, vector<1x8x32xbf16>
    %1 = vector.shape_cast %0 : vector<1x8x32xbf16> to vector<8x32xbf16>
    %c0_2 = arith.constant 0 : index
    %c0_3 = arith.constant 0 : index
    %c0_4 = arith.constant 0 : index
    %2 = vector.load %arg3[%c0_2, %c0_3, %c0_4] : memref<1x32x96xbf16, #tpu.memory_space<vmem>>, vector<1x32x96xbf16>
    %3 = vector.shape_cast %2 : vector<1x32x96xbf16> to vector<32x96xbf16>
    %cst = arith.constant dense<0.000000e+00> : vector<8x96xf32>
    %4 = tpu.matmul %1, %3, %cst {dimension_numbers = #tpu.dot_dimension_numbers<[1], [0], [0], [1], [0, 0, 1, 1], [], []>} : vector<8x32xbf16>, vector<32x96xbf16>, vector<8x96xf32> -> vector<8x96xf32>
    %5 = vector.extract_strided_slice %4 {offsets = [0, 0], sizes = [8, 32], strides = [1, 1]} : vector<8x96xf32> to vector<8x32xf32>
    %c0_5 = arith.constant 0 : index
    %c0_6 = arith.constant 0 : index
    %c0_7 = arith.constant 0 : index
    %6 = vector.load %arg4[%c0_5, %c0_6, %c0_7] : memref<1x1x32xf32, #tpu.memory_space<vmem>>, vector<1x1x32xf32>
    %7 = vector.shape_cast %6 : vector<1x1x32xf32> to vector<1x32xf32>
    %8 = vector.broadcast %7 : vector<1x32xf32> to vector<8x32xf32>
    %9 = arith.addf %5, %8 : vector<8x32xf32>
    %10 = vector.extract_strided_slice %4 {offsets = [0, 32], sizes = [8, 32], strides = [1, 1]} : vector<8x96xf32> to vector<8x32xf32>
    %11 = vector.extract_strided_slice %4 {offsets = [0, 64], sizes = [8, 32], strides = [1, 1]} : vector<8x96xf32> to vector<8x32xf32>
    %c0_8 = arith.constant 0 : index
    %c0_9 = arith.constant 0 : index
    %c0_10 = arith.constant 0 : index
    %12 = vector.load %arg5[%c0_8, %c0_9, %c0_10] : memref<1x1x32xf32, #tpu.memory_space<vmem>>, vector<1x1x32xf32>
    %13 = vector.shape_cast %12 : vector<1x1x32xf32> to vector<1x32xf32>
    %14 = vector.broadcast %13 : vector<1x32xf32> to vector<8x32xf32>
    %15 = arith.addf %11, %14 : vector<8x32xf32>
    %c0_11 = arith.constant 0 : index
    %c0_12 = arith.constant 0 : index
    %c0_13 = arith.constant 0 : index
    %c0_14 = arith.constant 0 : index
    %16 = vector.load %arg6[%c0_11, %c0_12, %c0_13, %c0_14] : memref<1x1x1x8xf32, #tpu.memory_space<vmem>>, vector<1x1x1x8xf32>
    %17 = vector.shape_cast %16 : vector<1x1x1x8xf32> to vector<1x8xf32>
    %18 = vector.extract_strided_slice %9 {offsets = [0, 0], sizes = [8, 8], strides = [1, 1]} : vector<8x32xf32> to vector<8x8xf32>
    %19 = arith.truncf %18 : vector<8x8xf32> to vector<8x8xbf16>
    %20 = vector.extract_strided_slice %10 {offsets = [0, 0], sizes = [8, 8], strides = [1, 1]} : vector<8x32xf32> to vector<8x8xf32>
    %21 = arith.truncf %20 : vector<8x8xf32> to vector<8x8xbf16>
    %22 = vector.extract_strided_slice %15 {offsets = [0, 0], sizes = [8, 8], strides = [1, 1]} : vector<8x32xf32> to vector<8x8xf32>
    %23 = arith.truncf %22 : vector<8x8xf32> to vector<8x8xbf16>
    %cst_15 = arith.constant dense<0.000000e+00> : vector<8x8xf32>
    %24 = tpu.matmul %19, %21, %cst_15 {dimension_numbers = #tpu.dot_dimension_numbers<[1], [1], [0], [0], [0, 0, 1, 0], [], []>} : vector<8x8xbf16>, vector<8x8xbf16>, vector<8x8xf32> -> vector<8x8xf32>
    %cst_16 = arith.constant 0.353553385 : f32
    %25 = vector.broadcast %cst_16 : f32 to vector<8x8xf32>
    %26 = arith.mulf %24, %25 : vector<8x8xf32>
    %27 = vector.broadcast %17 : vector<1x8xf32> to vector<8x8xf32>
    %28 = arith.addf %26, %27 : vector<8x8xf32>
    %cst_17 = arith.constant dense<0xFF800000> : vector<8xf32>
    %29 = vector.multi_reduction <maximumf>, %28, %cst_17 [1] : vector<8x8xf32> to vector<8xf32>
    %30 = vector.shape_cast %29 : vector<8xf32> to vector<8x1xf32>
    %31 = vector.broadcast %30 : vector<8x1xf32> to vector<8x8xf32>
    %32 = arith.subf %28, %31 : vector<8x8xf32>
    %33 = math.exp %32 : vector<8x8xf32>
    %cst_18 = arith.constant dense<0.000000e+00> : vector<8xf32>
    %34 = vector.multi_reduction <add>, %33, %cst_18 [1] : vector<8x8xf32> to vector<8xf32>
    %35 = vector.shape_cast %34 : vector<8xf32> to vector<8x1xf32>
    %36 = tpu.reciprocal %35 {approx = true} : vector<8x1xf32> -> vector<8x1xf32>
    %37 = vector.broadcast %36 : vector<8x1xf32> to vector<8x8xf32>
    %38 = arith.mulf %33, %37 : vector<8x8xf32>
    %39 = arith.truncf %38 : vector<8x8xf32> to vector<8x8xbf16>
    %cst_19 = arith.constant dense<0.000000e+00> : vector<8x8xf32>
    %40 = tpu.matmul %39, %23, %cst_19 {dimension_numbers = #tpu.dot_dimension_numbers<[1], [0], [0], [1], [0, 0, 1, 1], [], []>} : vector<8x8xbf16>, vector<8x8xbf16>, vector<8x8xf32> -> vector<8x8xf32>
    %c0_20 = arith.constant 0 : index
    %c0_21 = arith.constant 0 : index
    %c0_22 = arith.constant 0 : index
    %41 = vector.load %arg7[%c0_20, %c0_21, %c0_22] : memref<1x8x32xf32, #tpu.memory_space<vmem>>, vector<1x8x8xf32>
    %42 = vector.shape_cast %41 : vector<1x8x8xf32> to vector<8x8xf32>
    %43 = vector.shape_cast %40 : vector<8x8xf32> to vector<1x8x8xf32>
    tpu.vector_store %arg7[%c0_20, %c0_21, %c0_22], %43 {strides = array<i32>} : memref<1x8x32xf32, #tpu.memory_space<vmem>>, vector<1x8x8xf32>,
    %44 = vector.extract_strided_slice %9 {offsets = [0, 8], sizes = [8, 8], strides = [1, 1]} : vector<8x32xf32> to vector<8x8xf32>
    %45 = arith.truncf %44 : vector<8x8xf32> to vector<8x8xbf16>
    %46 = vector.extract_strided_slice %10 {offsets = [0, 8], sizes = [8, 8], strides = [1, 1]} : vector<8x32xf32> to vector<8x8xf32>
    %47 = arith.truncf %46 : vector<8x8xf32> to vector<8x8xbf16>
    %48 = vector.extract_strided_slice %15 {offsets = [0, 8], sizes = [8, 8], strides = [1, 1]} : vector<8x32xf32> to vector<8x8xf32>
    %49 = arith.truncf %48 : vector<8x8xf32> to vector<8x8xbf16>
    %cst_23 = arith.constant dense<0.000000e+00> : vector<8x8xf32>
    %50 = tpu.matmul %45, %47, %cst_23 {dimension_numbers = #tpu.dot_dimension_numbers<[1], [1], [0], [0], [0, 0, 1, 0], [], []>} : vector<8x8xbf16>, vector<8x8xbf16>, vector<8x8xf32> -> vector<8x8xf32>
    %cst_24 = arith.constant 0.353553385 : f32
    %51 = vector.broadcast %cst_24 : f32 to vector<8x8xf32>
    %52 = arith.mulf %50, %51 : vector<8x8xf32>
    %53 = vector.broadcast %17 : vector<1x8xf32> to vector<8x8xf32>
    %54 = arith.addf %52, %53 : vector<8x8xf32>
    %cst_25 = arith.constant dense<0xFF800000> : vector<8xf32>
    %55 = vector.multi_reduction <maximumf>, %54, %cst_25 [1] : vector<8x8xf32> to vector<8xf32>
    %56 = vector.shape_cast %55 : vector<8xf32> to vector<8x1xf32>
    %57 = vector.broadcast %56 : vector<8x1xf32> to vector<8x8xf32>
    %58 = arith.subf %54, %57 : vector<8x8xf32>
    %59 = math.exp %58 : vector<8x8xf32>
    %cst_26 = arith.constant dense<0.000000e+00> : vector<8xf32>
    %60 = vector.multi_reduction <add>, %59, %cst_26 [1] : vector<8x8xf32> to vector<8xf32>
    %61 = vector.shape_cast %60 : vector<8xf32> to vector<8x1xf32>
    %62 = tpu.reciprocal %61 {approx = true} : vector<8x1xf32> -> vector<8x1xf32>
    %63 = vector.broadcast %62 : vector<8x1xf32> to vector<8x8xf32>
    %64 = arith.mulf %59, %63 : vector<8x8xf32>
    %65 = arith.truncf %64 : vector<8x8xf32> to vector<8x8xbf16>
    %cst_27 = arith.constant dense<0.000000e+00> : vector<8x8xf32>
    %66 = tpu.matmul %65, %49, %cst_27 {dimension_numbers = #tpu.dot_dimension_numbers<[1], [0], [0], [1], [0, 0, 1, 1], [], []>} : vector<8x8xbf16>, vector<8x8xbf16>, vector<8x8xf32> -> vector<8x8xf32>
    %c0_28 = arith.constant 0 : index
    %c0_29 = arith.constant 0 : index
    %c8 = arith.constant 8 : index
    %67 = vector.load %arg7[%c0_28, %c0_29, %c8] : memref<1x8x32xf32, #tpu.memory_space<vmem>>, vector<1x8x8xf32>
    %68 = vector.shape_cast %67 : vector<1x8x8xf32> to vector<8x8xf32>
    %69 = vector.shape_cast %66 : vector<8x8xf32> to vector<1x8x8xf32>
    tpu.vector_store %arg7[%c0_28, %c0_29, %c8], %69 {strides = array<i32>} : memref<1x8x32xf32, #tpu.memory_space<vmem>>, vector<1x8x8xf32>,
    %70 = vector.extract_strided_slice %9 {offsets = [0, 16], sizes = [8, 8], strides = [1, 1]} : vector<8x32xf32> to vector<8x8xf32>
    %71 = arith.truncf %70 : vector<8x8xf32> to vector<8x8xbf16>
    %72 = vector.extract_strided_slice %10 {offsets = [0, 16], sizes = [8, 8], strides = [1, 1]} : vector<8x32xf32> to vector<8x8xf32>
    %73 = arith.truncf %72 : vector<8x8xf32> to vector<8x8xbf16>
    %74 = vector.extract_strided_slice %15 {offsets = [0, 16], sizes = [8, 8], strides = [1, 1]} : vector<8x32xf32> to vector<8x8xf32>
    %75 = arith.truncf %74 : vector<8x8xf32> to vector<8x8xbf16>
    %cst_30 = arith.constant dense<0.000000e+00> : vector<8x8xf32>
    %76 = tpu.matmul %71, %73, %cst_30 {dimension_numbers = #tpu.dot_dimension_numbers<[1], [1], [0], [0], [0, 0, 1, 0], [], []>} : vector<8x8xbf16>, vector<8x8xbf16>, vector<8x8xf32> -> vector<8x8xf32>
    %cst_31 = arith.constant 0.353553385 : f32
    %77 = vector.broadcast %cst_31 : f32 to vector<8x8xf32>
    %78 = arith.mulf %76, %77 : vector<8x8xf32>
    %79 = vector.broadcast %17 : vector<1x8xf32> to vector<8x8xf32>
    %80 = arith.addf %78, %79 : vector<8x8xf32>
    %cst_32 = arith.constant dense<0xFF800000> : vector<8xf32>
    %81 = vector.multi_reduction <maximumf>, %80, %cst_32 [1] : vector<8x8xf32> to vector<8xf32>
    %82 = vector.shape_cast %81 : vector<8xf32> to vector<8x1xf32>
    %83 = vector.broadcast %82 : vector<8x1xf32> to vector<8x8xf32>
    %84 = arith.subf %80, %83 : vector<8x8xf32>
    %85 = math.exp %84 : vector<8x8xf32>
    %cst_33 = arith.constant dense<0.000000e+00> : vector<8xf32>
    %86 = vector.multi_reduction <add>, %85, %cst_33 [1] : vector<8x8xf32> to vector<8xf32>
    %87 = vector.shape_cast %86 : vector<8xf32> to vector<8x1xf32>
    %88 = tpu.reciprocal %87 {approx = true} : vector<8x1xf32> -> vector<8x1xf32>
    %89 = vector.broadcast %88 : vector<8x1xf32> to vector<8x8xf32>
    %90 = arith.mulf %85, %89 : vector<8x8xf32>
    %91 = arith.truncf %90 : vector<8x8xf32> to vector<8x8xbf16>
    %cst_34 = arith.constant dense<0.000000e+00> : vector<8x8xf32>
    %92 = tpu.matmul %91, %75, %cst_34 {dimension_numbers = #tpu.dot_dimension_numbers<[1], [0], [0], [1], [0, 0, 1, 1], [], []>} : vector<8x8xbf16>, vector<8x8xbf16>, vector<8x8xf32> -> vector<8x8xf32>
    %c0_35 = arith.constant 0 : index
    %c0_36 = arith.constant 0 : index
    %c16 = arith.constant 16 : index
    %93 = vector.load %arg7[%c0_35, %c0_36, %c16] : memref<1x8x32xf32, #tpu.memory_space<vmem>>, vector<1x8x8xf32>
    %94 = vector.shape_cast %93 : vector<1x8x8xf32> to vector<8x8xf32>
    %95 = vector.shape_cast %92 : vector<8x8xf32> to vector<1x8x8xf32>
    tpu.vector_store %arg7[%c0_35, %c0_36, %c16], %95 {strides = array<i32>} : memref<1x8x32xf32, #tpu.memory_space<vmem>>, vector<1x8x8xf32>,
    %96 = vector.extract_strided_slice %9 {offsets = [0, 24], sizes = [8, 8], strides = [1, 1]} : vector<8x32xf32> to vector<8x8xf32>
    %97 = arith.truncf %96 : vector<8x8xf32> to vector<8x8xbf16>
    %98 = vector.extract_strided_slice %10 {offsets = [0, 24], sizes = [8, 8], strides = [1, 1]} : vector<8x32xf32> to vector<8x8xf32>
    %99 = arith.truncf %98 : vector<8x8xf32> to vector<8x8xbf16>
    %100 = vector.extract_strided_slice %15 {offsets = [0, 24], sizes = [8, 8], strides = [1, 1]} : vector<8x32xf32> to vector<8x8xf32>
    %101 = arith.truncf %100 : vector<8x8xf32> to vector<8x8xbf16>
    %cst_37 = arith.constant dense<0.000000e+00> : vector<8x8xf32>
    %102 = tpu.matmul %97, %99, %cst_37 {dimension_numbers = #tpu.dot_dimension_numbers<[1], [1], [0], [0], [0, 0, 1, 0], [], []>} : vector<8x8xbf16>, vector<8x8xbf16>, vector<8x8xf32> -> vector<8x8xf32>
    %cst_38 = arith.constant 0.353553385 : f32
    %103 = vector.broadcast %cst_38 : f32 to vector<8x8xf32>
    %104 = arith.mulf %102, %103 : vector<8x8xf32>
    %105 = vector.broadcast %17 : vector<1x8xf32> to vector<8x8xf32>
    %106 = arith.addf %104, %105 : vector<8x8xf32>
    %cst_39 = arith.constant dense<0xFF800000> : vector<8xf32>
    %107 = vector.multi_reduction <maximumf>, %106, %cst_39 [1] : vector<8x8xf32> to vector<8xf32>
    %108 = vector.shape_cast %107 : vector<8xf32> to vector<8x1xf32>
    %109 = vector.broadcast %108 : vector<8x1xf32> to vector<8x8xf32>
    %110 = arith.subf %106, %109 : vector<8x8xf32>
    %111 = math.exp %110 : vector<8x8xf32>
    %cst_40 = arith.constant dense<0.000000e+00> : vector<8xf32>
    %112 = vector.multi_reduction <add>, %111, %cst_40 [1] : vector<8x8xf32> to vector<8xf32>
    %113 = vector.shape_cast %112 : vector<8xf32> to vector<8x1xf32>
    %114 = tpu.reciprocal %113 {approx = true} : vector<8x1xf32> -> vector<8x1xf32>
    %115 = vector.broadcast %114 : vector<8x1xf32> to vector<8x8xf32>
    %116 = arith.mulf %111, %115 : vector<8x8xf32>
    %117 = arith.truncf %116 : vector<8x8xf32> to vector<8x8xbf16>
    %cst_41 = arith.constant dense<0.000000e+00> : vector<8x8xf32>
    %118 = tpu.matmul %117, %101, %cst_41 {dimension_numbers = #tpu.dot_dimension_numbers<[1], [0], [0], [1], [0, 0, 1, 1], [], []>} : vector<8x8xbf16>, vector<8x8xbf16>, vector<8x8xf32> -> vector<8x8xf32>
    %c0_42 = arith.constant 0 : index
    %c0_43 = arith.constant 0 : index
    %c24 = arith.constant 24 : index
    %119 = vector.load %arg7[%c0_42, %c0_43, %c24] : memref<1x8x32xf32, #tpu.memory_space<vmem>>, vector<1x8x8xf32>
    %120 = vector.shape_cast %119 : vector<1x8x8xf32> to vector<8x8xf32>
    %121 = vector.shape_cast %118 : vector<8x8xf32> to vector<1x8x8xf32>
    tpu.vector_store %arg7[%c0_42, %c0_43, %c24], %121 {strides = array<i32>} : memref<1x8x32xf32, #tpu.memory_space<vmem>>, vector<1x8x8xf32>,
    return
  }
  func.func @transform_0(%arg0: i32, %arg1: i32) -> (i32, i32, i32) {
    %c0_i32 = arith.constant 0 : i32
    %c0_i32_0 = arith.constant 0 : i32
    %c0_i32_1 = arith.constant 0 : i32
    return %arg1, %c0_i32, %c0_i32_0 : i32, i32, i32
  }
  func.func @transform_1(%arg0: i32, %arg1: i32) -> (i32, i32, i32) {
    %c0_i32 = arith.constant 0 : i32
    %c0_i32_0 = arith.constant 0 : i32
    %c0_i32_1 = arith.constant 0 : i32
    return %arg0, %c0_i32, %c0_i32_0 : i32, i32, i32
  }
  func.func @transform_2(%arg0: i32, %arg1: i32) -> (i32, i32, i32) {
    %c0_i32 = arith.constant 0 : i32
    %c0_i32_0 = arith.constant 0 : i32
    %c0_i32_1 = arith.constant 0 : i32
    return %arg0, %c0_i32, %c0_i32_0 : i32, i32, i32
  }
  func.func @transform_3(%arg0: i32, %arg1: i32) -> (i32, i32, i32) {
    %c0_i32 = arith.constant 0 : i32
    %c0_i32_0 = arith.constant 0 : i32
    %c0_i32_1 = arith.constant 0 : i32
    return %arg0, %c0_i32, %c0_i32_0 : i32, i32, i32
  }
  func.func @transform_4(%arg0: i32, %arg1: i32) -> (i32, i32, i32, i32) {
    %c0_i32 = arith.constant 0 : i32
    %c0_i32_0 = arith.constant 0 : i32
    %c0_i32_1 = arith.constant 0 : i32
    %c0_i32_2 = arith.constant 0 : i32
    return %arg1, %c0_i32, %c0_i32_0, %c0_i32_1 : i32, i32, i32, i32
  }
  func.func @transform_5(%arg0: i32, %arg1: i32) -> (i32, i32, i32) {
    %c0_i32 = arith.constant 0 : i32
    %c0_i32_0 = arith.constant 0 : i32
    return %arg1, %c0_i32, %arg0 : i32, i32, i32
  }
}

</mosaic_0001>

<bundles_post_ra>
// kernel: tpu_custom_call.1
= control target key start
LH: loop header
LB: loop body
LE: loop exit
PB: predicated region body
PF: predicated region fallthrough
CT: control target
= control target key end

     0   :  { %10 = vsyncpa [#allocation3], 0  ;;  %s1343_s0 = inlined_call_operand.hbm [shape: bf16[2,8,32], index: 0, kind: input, shape index: {}]   ;;  %s1344_s1 = inlined_call_operand.hbm [shape: bf16[1,32,96], index: 1, kind: input, shape index: {}]   ;;  %s1345_s2 = inlined_call_operand.vmem [shape: f32[1,1,32], index: 2, kind: input, shape index: {}]   ;;  %s1346_s3 = inlined_call_operand.hbm [shape: f32[1,1,32], index: 3, kind: input, shape index: {}]   ;;  %s1347_s4 = inlined_call_operand.vmem [shape: f32[2,1,1,8], index: 4, kind: input, shape index: {}]   ;;  %s1348_s5 = inlined_call_operand.hbm [shape: f32[2,8,32], index: 5, kind: output, shape index: {}]  }
   0x1   :  { %12 = vsyncpa [#allocation3 + $0x1], 0 }
   0x2   :  { %13 = vsyncpa [#allocation6], 0 }
   0x3   :  { %14 = vsyncpa [#allocation4], 0 }
   0x4   :  { %16 = vsyncpa [#allocation4 + $0x1], 0  ;;  %s1157_s18 = smov 0   ;;  %s1159_s19 = smov 0  }
   0x5   :  { %s1161_s20 = smov 0   ;;  %s1163_s21 = smov 0  }
   0x6   :  { %s1165_s22 = smov 0   ;;  %s1167_s23 = smov 0  }
   0x7 LB: > { %s776_s24 = sadd.s32 4294967295, %s1107_s23   ;;  %p778_p0 = scmp.ge.s32.totalorder %s1107_s23, 1  ;;  %s1107_s23 = sphi %s1167_s23, %s22_s23   ;;  %s1103_s22 = sphi %s1165_s22, %s1358_s22   ;;  %s1099_s21 = sphi %s1163_s21, %s1357_s21   ;;  %s1095_s20 = sphi %s1161_s20, %s1356_s20   ;;  %s1091_s19 = sphi %s1159_s19, %s1355_s19   ;;  %s1087_s18 = sphi %s1157_s18, %s1354_s18  }
   0x8   : > { %p1191_p1 = scmp.eq.s32.totalorder %s776_s24, 0  ;;  %p197_p2 = scmp.lt.s32.totalorder %s1107_s23, 3 }
   0x9   : > { %s211_s28 = sshll.u32 %s1344_s1, 4  ;;  %s1109_s30 = smov [#allocation5]   ;;  %s212_s28 = int_to_ptr.hbm [resolvable:$true] %s211_s28 }
   0xa   : > { %p1199_p3 = pnand %p778_p0, %p197_p2  ;;  %s213_s6 = sshll.u32 %s1109_s30, 4  ;;  %s214_s6 = int_to_ptr.vmem [resolvable:$true] %s213_s6 }
   0xb   : > { %p782_p6 = scmp.ge.s32.totalorder %s1107_s23, 2  ;;  %s233_s9 = sshll.u32 %s1346_s3, 4  ;;  %s234_s9 = int_to_ptr.hbm [resolvable:$true] %s233_s9 }
   0xc   : > { %p825_p4 = pneg %p1199_p3  ;;  %s1110_s10 = smov 64  }
   0xd   : > { %s1111_s11 = smov 4   ;;  %s1112_s12 = smov [#allocation7]  }
   0xe   : > { %p826_p5 = pnand %p825_p4, %p1191_p1  ;;  %s235_s13 = sshll.u32 %s1112_s12, 4  ;;  %s236_s13 = int_to_ptr.vmem [resolvable:$true] %s235_s13 }
   0xf   : > { %s31_s14 = sadd.s32 1, %s1103_s22  ;;  %s777_s15 = sadd.s32 4294967294, %s1107_s23  }
  0x10   : > { %828 = dma.hbm_to_vmem [thread:$0]  (!%p826_p5), %s212_s28, 256, %s214_s6, [#allocation6], %s1110_s10, %s1110_s10, %s1111_s11  }
  0x11   : > { %831 = dma.hbm_to_vmem [thread:$0]  (!%p826_p5), %s234_s9, 16, %s236_s13, [#allocation6]  }
  0x12   : > { %p32_p7 = scmp.ge.s32.totalorder %s31_s14, 2  ;;  %s41_s16 = sadd.s32 1, %s1095_s20 }
  0x13   : > { %p48_p8 = scmp.ne.s32.totalorder %s1095_s20, %s1091_s19  ;;  %p49_p9 = scmp.eq.s32.totalorder %s1107_s23, 0 }
  0x14   : > { %s1360_s14 = smov (%p32_p7, %s31_s14), 0  ;;  %p54_p10 = scmp.ne.s32.totalorder %s1091_s19, %s1087_s18 }
  0x15   : > { %s38_s17 = ssub.s32 %s1103_s22, %s1360_s14  ;;  %p184_p11 = scmp.eq.s32.totalorder %s776_s24, 1 }
  0x16   : > { %p39_p12 = scmp.eq.s32.totalorder %s38_s17, 0  ;;  %p1227_p13 = por %p1191_p1, %p54_p10 }
  0x17   : > { %p1231_p0 = por %p184_p11, %p48_p8  ;;  %p190_p2 = scmp.eq.s32.totalorder %s777_s15, 1 }
  0x18   : > { %s1236_s28 = scalar_select %p39_p12, %s1095_s20, %s41_s16  }
  0x19   : > { %p50_p4 = por %p49_p9, %p48_p8  ;;  %p1238_p5 = por %p190_p2, %p54_p10 }
  0x1a   : > { %s246_s6 = sand.u32 1, %s1095_s20   ;;  %s784_s24 = sshll.u32 %s1103_s22, 2 }
  0x1b   : > { %p842_p7 = scmp.lt.s32.totalorder %s1107_s23, 2  ;;  %s783_s7 = sshll.u32 %s246_s6, 2 }
  0x1c   : > { %s254_s10 = scalar_lea.hbm %s1343_s0, %s784_s24  ;;  %s250_s12 = scalar_lea.vmem [#allocation2], %s783_s7 }
  0x1d   : > { %s256_s11 = sshll.u32 %s254_s10, 4  ;;  %s258_s13 = sshll.u32 %s250_s12, 4  ;;  %s257_s11 = int_to_ptr.hbm [resolvable:$true] %s256_s11  ;;  %s259_s13 = int_to_ptr.vmem [resolvable:$true] %s258_s13 }
  0x1e   : > { %p833_p11 = pnand %p842_p7, %p50_p4  ;;  %s247_s15 = scalar_lea.sflag [#allocation3], %s246_s6 }
  0x1f   : > { %273 = sbr.rel (%p1199_p3) target bundleno = 980 (0x3d4), region = 40  ;;  %s1251_s16 = sand.u32 (!%p1199_p3), 1, %s1091_s19  }
  0x20   : > { %835 = dma.hbm_to_vmem [thread:$0]  (!%p833_p11), %s257_s11, 64, %s259_s13, %s247_s15  }
  0x21   : > { %s786_s17 = sshll.u32 (!%p1199_p3), %s1251_s16, 2  ;;  %s276_s8 = scalar_lea.sflag (!%p1199_p3), [#allocation3], %s1251_s16 }
  0x22   : > { %s279_s24 = scalar_lea.vmem (!%p1199_p3), [#allocation2], %s786_s17 }
  0x24   : > { %1074 = dma.done.wait (%p1227_p13), %s276_s8, 64  }
  0x25   : > { %1076 = vsyncadd (%p1227_p13), %s276_s8, 4294967232 }
  0x26   : > { %1078 = dma.done.wait (%p1191_p1), [#allocation6], 272  }
  0x27   : > { %1080 = vsyncadd (%p1191_p1), [#allocation6], 4294967024  ;;  %v812_v0 = vld [vmem:[#allocation5 + $0x8] sm:$0xff]  ;;  %v811_v1 = vld [vmem:[#allocation5] sm:$0xff]  ;;  %vm347_vm0 = vcmask 261120   ;;  %s1113_s25 = smov 96  }
  0x28   : > { %357 = vmatpush.bf16.msra.mxu0 %v812_v0  ;;  %v330_v2 = vld [vmem:[%s279_s24] sm:$0xf]  ;;  %s1114_s26 = smov 104   ;;  %s1115_s7 = smov 120   ;;  %v913_v9 = vld [vmem:[#allocation7] ss:$0 sm:$0xff] }
  0x29   : > { %v912_v3 = vld [vmem:[%s1345_s2] ss:$0 sm:$0xff]  ;;  %s1116_s9 = smov 88   ;;  %s1117_s10 = smov 80   ;;  %vm383_vm1 = vcmask 64512   ;;  %vm426_vm2 = vcmask 1043456  }
  0x2a   : > { %s1118_s11 = smov 72   ;;  %s1119_s12 = smov 112   ;;  %vm507_vm3 = vcmask 130112   ;;  %vm571_vm4 = vcmask 195712   ;;  %vm635_vm5 = vcmask 261312  }
  0x2b   : > { %s1120_s13 = smov 64   ;;  %p326_p1 = scmp.lt.s32.totalorder %s1099_s21, 1 }
  0x2c   : > { %358 = vmatpush.bf16.msra.mxu0 %v811_v1  ;;  %s1121_s29 = smov 56   ;;  %s1122_s6 = smov 40  }
  0x2d   : > { %s327_s15 = scalar_select %p326_p1, %s1099_s21, 1 }
  0x2f   : > { %798 = vmatmul.msk.bf16.vlgmr.msra.gmra.mxu0 %vm347_vm0, %v330_v2  ;;  %s328_s24 = scalar_lea.vmem %s1347_s4, %s327_s15 }
  0x30   : > { %v914_v21 = vld [vmem:[%s328_s24] ss:$0 sm:$0xff] }
  0xac   : > { %v1266_v4 = vpop.f32.mrf.mxu0 }
  0xad   : > { %v368_v5 = vadd.f32 %v912_v3, %v1266_v4  ;;  %v378_v6 = vpack.c.bf16 %v1266_v4, %v1266_v4 }
  0xaf   : > { %v377_v7 = vpack.c.bf16 %v368_v5, %v368_v5  ;;  %381 = vrot.lane.b32.xlu0 %v378_v6, %s1113_s25  ;;  %s1123_s25 = smov 48  }
  0xb1   : > { %573 = vrot.lane.b32.xlu2 %v377_v7, %s1114_s26  ;;  %445 = vrot.lane.b32.xlu1 %v377_v7, %s1115_s7  ;;  %s789_s26 = sshll.u32 %s1251_s16, 3 }
  0xb2   : > { %s322_s7 = scalar_lea.vmem [#allocation8], %s789_s26 }
  0xb3   : > { %s651_s8 = sshll.u32 %s322_s7, 4  ;;  %s652_s8 = int_to_ptr.vmem [resolvable:$true] %s651_s8 }
  0xb4   : > { %v362_v8 = vpop.f32.mrf.mxu0 }
  0xb7   : > { %447 = vrot.lane.b32.xlu0 %v378_v6, %s1116_s9  ;;  %s1124_s9 = smov 8  }
  0xb9   : > { %511 = vrot.lane.b32.xlu2 %v378_v6, %s1117_s10  ;;  %575 = vrot.lane.b32.xlu1 %v378_v6, %s1118_s11  ;;  %s1125_s10 = smov 24   ;;  %s1126_s11 = smov 16  }
  0xbf   : > { %509 = vrot.lane.b32.xlu0 %v377_v7, %s1119_s12  ;;  %s808_s12 = sshll.u32 %s1099_s21, 3 }
  0xc0   : > { %s649_s17 = scalar_lea.hbm %s1348_s5, %s808_s12 }
  0xc1   : > { %s653_s24 = sshll.u32 %s649_s17, 4  ;;  %s654_s24 = int_to_ptr.hbm [resolvable:$true] %s653_s24 }
  0xc7   : > { %372 = vrot.lane.b32.xlu0 %v913_v9, %s1120_s13 }
 0x10b   : > { %v574_v10 = vpop.permute.xlu2 %573 }
 0x113   : > { %v512_v11 = vpop.permute.xlu2 %511 }
 0x114   : > { %v517_v12 = vsel %vm383_vm1, %v512_v11, 0 }
 0x115   : > { %526 = vmatpush.bf16.xpose.msrb.mxu0 %v517_v12 }
 0x121   : > { %v382_v13 = vpop.permute.xlu0 %381 }
 0x122   : > { %v388_v14 = vsel %vm383_vm1, %v382_v13, 0 }
 0x123   : > { %397 = vmatpush.bf16.xpose.msra.mxu1 %v388_v14  ;;  %v446_v15 = vpop.permute.xlu1 %445 }
 0x129   : > { %v448_v16 = vpop.permute.xlu0 %447 }
 0x12a   : > { %799 = vmatmul.msk.bf16.vlgmr.msra.gmra.mxu1 %vm383_vm1, %v377_v7  ;;  %v453_v17 = vsel %vm383_vm1, %v448_v16, 0 }
 0x12b   : > { %462 = vmatpush.bf16.xpose.msra.mxu3 %v453_v17  ;;  %v576_v18 = vpop.permute.xlu1 %575 }
 0x12c   : > { %v581_v19 = vsel %vm383_vm1, %v576_v18, 0 }
 0x131   : > { %v510_v20 = vpop.permute.xlu0 %509 }
 0x132   : > { %801 = vmatmul.msk.bf16.vlgmr.msra.gmra.mxu3 %vm383_vm1, %v446_v15  ;;  %803 = vmatmul.msk.bf16.vlgmr.msrb.gmra.mxu0 %vm383_vm1, %v510_v20 }
 0x133   : > { %590 = vmatpush.bf16.xpose.msrb.mxu3 %v581_v19 }
 0x139   : > { %v373_v42 = vpop.permute.xlu0 %372 }
 0x13a   : > { %v375_v43 = vadd.f32 %v373_v42, %v1266_v4 }
 0x13c   : > { %v379_v44 = vpack.c.bf16 %v375_v43, %v375_v43 }
 0x142   : > { %805 = vmatmul.msk.bf16.vlgmr.msrb.gmra.mxu3 %vm383_vm1, %v574_v10 }
 0x1a7   : > { %v399_v22 = vpop.f32.mrf.mxu1 }
 0x1a8   : > { %v403_v23 = vmul.f32 0.35355338, %v399_v22 }
 0x1aa   : > { %v407_v24 = vadd.f32 %v914_v21, %v403_v23 }
 0x1ac   : > { %v408_v25 = vsel %vm383_vm1, %v407_v24, -inf }
 0x1ad   : > { %409 = vmax.xlane.f32.xlu1 %v408_v25 }
 0x1af   : > { %v401_v26 = vpop.f32.mrf.mxu1  ;;  %v528_v27 = vpop.f32.mrf.mxu0 }
 0x1b0   : > { %v532_v32 = vmul.f32 0.35355338, %v528_v27 }
 0x1b2   : > { %v533_v35 = vadd.f32 %v914_v21, %v532_v32 }
 0x1b4   : > { %v534_v36 = vsel %vm383_vm1, %v533_v35, -inf }
 0x1b5   : > { %v464_v28 = vpop.f32.mrf.mxu3 }
 0x1b6   : > { %v468_v29 = vmul.f32 0.35355338, %v464_v28 }
 0x1b7   : > { %v530_v30 = vpop.f32.mrf.mxu0 }
 0x1b8   : > { %v469_v31 = vadd.f32 %v914_v21, %v468_v29 }
 0x1ba   : > { %v470_v33 = vsel %vm383_vm1, %v469_v31, -inf }
 0x1bb   : > { %471 = vmax.xlane.f32.xlu2 %v470_v33 }
 0x1bd   : > { %v466_v34 = vpop.f32.mrf.mxu3 }
 0x1c3   : > { %535 = vmax.xlane.f32.xlu2 %v534_v36 }
 0x1c5   : > { %v592_v37 = vpop.f32.mrf.mxu3 }
 0x1c6   : > { %v596_v38 = vmul.f32 0.35355338, %v592_v37 }
 0x1c8   : > { %v597_v39 = vadd.f32 %v914_v21, %v596_v38 }
 0x1ca   : > { %v598_v40 = vsel %vm383_vm1, %v597_v39, -inf }
 0x1cb   : > { %599 = vmax.xlane.f32.xlu0 %v598_v40 }
 0x1cd   : > { %v594_v41 = vpop.f32.mrf.mxu3 }
 0x1db   : > { %421 = vrot.lane.b32.xlu2 %v379_v44, %s1120_s13 }
 0x1df   : > { %482 = vrot.lane.b32.xlu0 %v379_v44, %s1121_s29  ;;  %s638_s29 = scalar_lea.sflag [#allocation4], %s1251_s16 }
 0x1e3   : > { %610 = vrot.lane.b32.xlu2 %v379_v44, %s1122_s6  ;;  %s1035_s6 = sshra.s32 %s654_s24, 4  ;;  %s1036_s6 = int_to_ptr.hbm [resolvable:$true] %s1035_s6 }
 0x1e4   : > { %p1042_p10 = scmp.lt.s32.totalorder %s1036_s6, %s1348_s5 }
 0x220   : > { %v410_v45 = vpop.xlane.xlu1 %409 }
 0x221   : > { %v411_v46 = vsub.f32 %v407_v24, %v410_v45 }
 0x223   : > { %v412_v47 = vmul.f32 1.442695, %v411_v46 }
 0x225   : > { %915 = vpow2.f32 %v412_v47 }
 0x22b   : > { %v916_v48 = vpop.eup %915 }
 0x22c   : > { %v414_v49 = vsel %vm383_vm1, %v916_v48, 0.0 }
 0x22d   : > { %415 = vadd.xlane.f32.xlu1 %v414_v49 }
 0x22e   : > { %v472_v50 = vpop.xlane.xlu2 %471 }
 0x22f   : > { %v473_v53 = vsub.f32 %v469_v31, %v472_v50 }
 0x231   : > { %v474_v55 = vmul.f32 1.442695, %v473_v53 }
 0x236   : > { %v536_v51 = vpop.xlane.xlu2 %535 }
 0x237   : > { %v537_v52 = vsub.f32 %v533_v35, %v536_v51 }
 0x239   : > { %v538_v54 = vmul.f32 1.442695, %v537_v52 }
 0x23b   : > { %917 = vpow2.f32 %v538_v54 }
 0x23c   : > { %919 = vpow2.f32 %v474_v55 }
 0x23e   : > { %v600_v56 = vpop.xlane.xlu0 %599  ;;  %v422_v57 = vpop.permute.xlu2 %421 }
 0x23f   : > { %v428_v58 = vsel %vm426_vm2, %v422_v57, 0  ;;  %v601_v60 = vsub.f32 %v597_v39, %v600_v56 }
 0x240   : > { %437 = vmatpush.bf16.msra.mxu2 %v428_v58 }
 0x241   : > { %v918_v59 = vpop.eup %917  ;;  %v602_v62 = vmul.f32 1.442695, %v601_v60 }
 0x242   : > { %v540_v61 = vsel %vm383_vm1, %v918_v59, 0.0  ;;  %v920_v63 = vpop.eup %919 }
 0x243   : > { %541 = vadd.xlane.f32.xlu1 %v540_v61  ;;  %921 = vpow2.f32 %v602_v62  ;;  %v476_v0 = vsel %vm383_vm1, %v920_v63, 0.0 }
 0x246   : > { %v611_v8 = vpop.permute.xlu2 %610 }
 0x247   : > { %v616_v10 = vsel %vm426_vm2, %v611_v8, 0 }
 0x249   : > { %v922_v1 = vpop.eup %921 }
 0x24a   : > { %v604_v3 = vsel %vm383_vm1, %v922_v1, 0.0 }
 0x24b   : > { %477 = vadd.xlane.f32.xlu1 %v476_v0 }
 0x251   : > { %v483_v2 = vpop.permute.xlu0 %482 }
 0x252   : > { %v488_v4 = vsel %vm426_vm2, %v483_v2, 0 }
 0x253   : > { %605 = vadd.xlane.f32.xlu1 %v604_v3  ;;  %497 = vmatpush.bf16.msrb.mxu2 %v488_v4 }
 0x26c   : > { %546 = vrot.lane.b32.xlu1 %v379_v44, %s1123_s25  ;;  %s1037_s25 = scalar_lea.hbm %s1036_s6, 8 }
 0x26d   : > { %p1038_p3 = scmp.ne.s32.totalorder %s1036_s6, %s1037_s25 }
 0x26f   : > { %p1039_p8 = pnand %p1038_p3, %p1231_p0 }
 0x271   : > { %p1040_p9 = pneg %p1039_p8 }
 0x2a0   : > { %v416_v5 = vpop.xlane.xlu1 %415 }
 0x2a1   : > { %923 = vrcp.f32 %v416_v5 }
 0x2a7   : > { %v924_v6 = vpop.eup %923 }
 0x2a8   : > { %v418_v7 = vmul.f32 %v924_v6, %v916_v48 }
 0x2aa   : > { %v419_v9 = vpack.c.bf16 %v418_v7, %v418_v7 }
 0x2ac   : > { %800 = vmatmul.msk.bf16.vlgmr.msra.gmra.mxu2 %vm383_vm1, %v419_v9 }
 0x2ad   : > { %625 = vmatpush.bf16.msra.mxu2 %v616_v10 }
 0x2b6   : > { %v542_v11 = vpop.xlane.xlu1 %541 }
 0x2be   : > { %v478_v12 = vpop.xlane.xlu1 %477 }
 0x2bf   : > { %925 = vrcp.f32 %v478_v12 }
 0x2c5   : > { %v926_v13 = vpop.eup %925 }
 0x2c6   : > { %v480_v14 = vmul.f32 %v926_v13, %v920_v63  ;;  %v606_v15 = vpop.xlane.xlu1 %605 }
 0x2c7   : > { %927 = vrcp.f32 %v606_v15 }
 0x2c8   : > { %v481_v16 = vpack.c.bf16 %v480_v14, %v480_v14  ;;  %929 = vrcp.f32 %v542_v11 }
 0x2ca   : > { %802 = vmatmul.msk.bf16.vlgmr.msrb.gmra.mxu2 %vm383_vm1, %v481_v16 }
 0x2cd   : > { %v928_v17 = vpop.eup %927 }
 0x2ce   : > { %v608_v18 = vmul.f32 %v928_v17, %v922_v1  ;;  %v930_v20 = vpop.eup %929 }
 0x2cf   : > { %v544_v21 = vmul.f32 %v930_v20, %v918_v59 }
 0x2d0   : > { %v609_v19 = vpack.c.bf16 %v608_v18, %v608_v18 }
 0x2d1   : > { %v545_v24 = vpack.c.bf16 %v544_v21, %v544_v21 }
 0x2da   : > { %806 = vmatmul.msk.bf16.vlgmr.msra.gmra.mxu2 %vm383_vm1, %v609_v19 }
 0x2de   : > { %v547_v22 = vpop.permute.xlu1 %546 }
 0x2df   : > { %v552_v23 = vsel %vm426_vm2, %v547_v22, 0 }
 0x2e0   : > { %561 = vmatpush.bf16.msrb.mxu1 %v552_v23 }
 0x2e3   : > { %804 = vmatmul.msk.bf16.vlgmr.msrb.gmra.mxu1 %vm383_vm1, %v545_v24 }
 0x32f   : > { %v439_v25 = vpop.f32.mrf.mxu2 }
 0x330   : > { %443 = vst.msk [vmem:[%s322_s7] sm:$0xff] %vm383_vm1, %v439_v25 }
 0x337   : > { %v441_v26 = vpop.f32.mrf.mxu2 }
 0x34d   : > { %v499_v27 = vpop.f32.mrf.mxu2 }
 0x34e   : > { %504 = vrot.lane.b32.xlu0 %v499_v27, %s1124_s9  ;;  %s1041_s9 = scalar_lea.hbm %s1348_s5, 16 }
 0x34f   : > { %p1043_p12 = scmp.lt.s32.totalorder %s1041_s9, %s1037_s25 }
 0x351   : > { %p1044_p13 = por %p1043_p12, %p1042_p10 }
 0x353   : > { %p1045_p2 = pnand %p1044_p13, %p1040_p9 }
 0x355   : > { %v501_v28 = vpop.f32.mrf.mxu2 }
 0x35d   : > { %v627_v29 = vpop.f32.mrf.mxu2 }
 0x35e   : > { %632 = vrot.lane.b32.xlu0 %v627_v29, %s1125_s10 }
 0x360   : > { %v563_v30 = vpop.f32.mrf.mxu1 }
 0x361   : > { %568 = vrot.lane.b32.xlu2 %v563_v30, %s1126_s11 }
 0x365   : > { %v629_v31 = vpop.f32.mrf.mxu2 }
 0x368   : > { %v565_v32 = vpop.f32.mrf.mxu1 }
 0x3bb   : > { %v569_v34 = vpop.permute.xlu2 %568 }
 0x3c0   : > { %v505_v33 = vpop.permute.xlu0 %504 }
 0x3c1   : > { %508 = vst.msk [vmem:[%s322_s7] sm:$0xff] %vm507_vm3, %v505_v33 }
 0x3c2   : > { %572 = vst.msk [vmem:[%s322_s7] sm:$0xff] %vm571_vm4, %v569_v34 }
 0x3d0   : > { %v633_v35 = vpop.permute.xlu0 %632 }
 0x3d1   : > { %636 = vst.msk [vmem:[%s322_s7] sm:$0xff] %vm635_vm5, %v633_v35 }
 0x3d2   : > { %1048 = shalt.err (!%p1045_p2)
}
 0x3d3   : > { %823 = dma.vmem_to_hbm [thread:$0]  (%p1231_p0), %s652_s8, 128, %s654_s24, %s638_s29  }
 0x3d4 PF: > { %s665_s16 = sand.u32 1, %s1087_s18   ;;  %p837_p4 = pnand %p782_p6, %p1238_p5 }
 0x3d5   : > { %s666_s7 = scalar_lea.sflag [#allocation4], %s665_s16 }
 0x3d6   : > { %p838_p7 = pneg %p837_p4 }
 0x3d8   : > { %1082 = dma.done.wait (%p838_p7), %s666_s7, 128  }
 0x3d9   : > { %1084 = vsyncadd (%p838_p7), %s666_s7, 4294967168  ;;  %s22_s23 = sadd.s32 1, %s1107_s23   ;;  %s1354_s18 = smov %s1091_s19 }
 0x3da   : > { %p19_p11 = scmp.ge.s32.totalorder %s22_s23, 4   ;;  %s1355_s19 = smov %s1095_s20 }
 0x3db   : > { %s1356_s20 = smov %s1236_s28  ;;  %s1357_s21 = smov %s1103_s22 }
 0x3dc   : > { %s1358_s22 = smov %s1360_s14  ;;  %21 = sbr.rel (!%p19_p11) target bundleno = 7 (0x7), region = 101 }
 0x3e1   :  { %672 = vsyncpa [#allocation3], 1 }
 0x3e2   :  { %674 = vsyncpa [#allocation3 + $0x1], 1 }
 0x3e3   :  { %675 = vsyncpa [#allocation6], 1 }
 0x3e4   :  { %676 = vsyncpa [#allocation4], 1 }
 0x3e5   :  { %678 = vsyncpa [#allocation4 + $0x1], 1 }

</bundles_post_ra>
